<compile_context>
chip_gen: v7x
topology: tpu7x:2x2x1
jax: 0.10.0
libtpu: 0.0.40
codegen_flags: <defaults>
</compile_context>

<pallas_src>
import functools

import jax
import jax.numpy as jnp
from jax.experimental import pallas as pl
from jax.experimental.pallas import tpu as pltpu

_MASK_VALUE = float(jnp.finfo(jnp.float32).min)  # finite "-inf" for the flash path


# ---------------------------------------------------------------------------
# Kernels
# ---------------------------------------------------------------------------
def _sdpa_attn_kernel(*refs, inv_temperature, has_mask):
    """One (batch, q-tile) step: full-Lk softmax; writes output AND attn."""
    if has_mask:
        q_ref, k_ref, v_ref, mask_ref, out_ref, attn_ref = refs
    else:
        q_ref, k_ref, v_ref, out_ref, attn_ref = refs
        mask_ref = None

    q = q_ref[0]          # (TQ, D)
    k = k_ref[0]          # (Lk, D)
    v = v_ref[0]          # (Lk, Dv)

    # Fold 1/temperature into q: touches TQ*D elements instead of TQ*Lk.
    q_scaled = q * jnp.asarray(inv_temperature, dtype=q.dtype)

    # scores = q @ k^T without an explicit transpose (contract last dims), f32 acc.
    scores = jax.lax.dot_general(
        q_scaled, k, dimension_numbers=(((1,), (1,)), ((), ())),
        preferred_element_type=jnp.float32)                      # (TQ, Lk)

    if has_mask:
        # -inf matches torch masked_fill(-inf)+softmax exactly (fully-masked rows
        # produce NaN, same as the reference module).
        scores = jnp.where(mask_ref[0] != 0, -jnp.inf, scores)

    s_max = jnp.max(scores, axis=-1, keepdims=True)
    e = jnp.exp(scores - s_max)
    denom = jnp.sum(e, axis=-1, keepdims=True)
    p = e * pl.reciprocal(denom, approx=False)

    # Cast once; reuse for both the attn store and the PV matmul.
    p_cast = p.astype(v.dtype)
    attn_ref[0] = p_cast if attn_ref.dtype == v.dtype else p.astype(attn_ref.dtype)
    out_ref[0] = jnp.dot(p_cast, v,
                         preferred_element_type=jnp.float32).astype(out_ref.dtype)


def _sdpa_flash_kernel(*refs, inv_temperature, has_mask):
    """Online-softmax step over one (batch, q-tile, k-tile); output only."""
    if has_mask:
        q_ref, k_ref, v_ref, mask_ref, out_ref, m_sc, l_sc, acc_sc = refs
    else:
        q_ref, k_ref, v_ref, out_ref, m_sc, l_sc, acc_sc = refs
        mask_ref = None

    kv = pl.program_id(2)

    @pl.when(kv == 0)
    def _():
        m_sc[...] = jnp.full_like(m_sc, _MASK_VALUE)
        l_sc[...] = jnp.zeros_like(l_sc)
        acc_sc[...] = jnp.zeros_like(acc_sc)

    q = q_ref[0]          # (TQ, D)
    k = k_ref[0]          # (TK, D)
    v = v_ref[0]          # (TK, Dv)

    q_scaled = q * jnp.asarray(inv_temperature, dtype=q.dtype)
    s = jax.lax.dot_general(
        q_scaled, k, dimension_numbers=(((1,), (1,)), ((), ())),
        preferred_element_type=jnp.float32)                      # (TQ, TK)

    if has_mask:
        # Finite fill keeps the running-max recurrence NaN-free.  (Rows that are
        # fully masked over the whole sequence yield finite garbage here instead
        # of the reference NaN -- documented corner case of this path.)
        s = jnp.where(mask_ref[0] != 0, _MASK_VALUE, s)

    m_prev = m_sc[...]
    m_new = jnp.maximum(m_prev, jnp.max(s, axis=-1, keepdims=True))
    alpha = jnp.exp(m_prev - m_new)
    p = jnp.exp(s - m_new)
    l_sc[...] = alpha * l_sc[...] + jnp.sum(p, axis=-1, keepdims=True)
    acc_sc[...] = alpha * acc_sc[...] + jnp.dot(
        p.astype(v.dtype), v, preferred_element_type=jnp.float32)
    m_sc[...] = m_new

    @pl.when(kv == pl.num_programs(2) - 1)
    def _():
        out_ref[0] = (acc_sc[...] *
                      pl.reciprocal(l_sc[...], approx=False)).astype(out_ref.dtype)


# ---------------------------------------------------------------------------
# Tiling / budgeting
# ---------------------------------------------------------------------------
def _vmem_budget():
    """(tiling budget, vmem_limit_bytes) sized per TPU generation."""
    cap = 128 * 1024 * 1024
    try:
        cap = int(getattr(pltpu.get_tpu_info(), "vmem_capacity_bytes", cap))
    except Exception:
        pass
    if cap <= 64 * 1024 * 1024:
        # v7x-class: 64 MiB physical VMEM; leave headroom for Mosaic scratch.
        return 24 * 1024 * 1024, 40 * 1024 * 1024
    # v5e / v6e: 128 MiB physical VMEM.
    return 56 * 1024 * 1024, 96 * 1024 * 1024


def _tq_candidates(Lq):
    """MXU-friendly q-tile sizes (128-aligned), largest first; full Lq always legal."""
    cands = [t for t in (1024, 768, 512, 384, 256, 128, 64, 32, 16, 8) if t <= Lq]
    if Lq not in cands:
        cands.append(Lq)              # full-extent block is legal even if unaligned
    cands = [t for t in cands if t == Lq or t % 8 == 0]
    return sorted(set(cands), reverse=True)


def _select_tq_full_lk(Lq, Lk, D, Dv, itemsize, mask_itemsize, budget_bytes):
    """Largest q tile that fits with full K/V resident (attn-producing path)."""
    cands = _tq_candidates(Lq)
    for tq in cands:
        in_bytes = (tq * D + Lk * D + Lk * Dv) * itemsize + tq * Lk * mask_itemsize
        out_bytes = (tq * Dv + tq * Lk) * itemsize
        # BlockSpec double-buffers inputs AND outputs; ~4 live f32 (TQ, Lk)
        # temporaries (scores, e, p, p_cast) during compute.
        live = 2 * (in_bytes + out_bytes) + 4 * tq * Lk * 4
        if live <= budget_bytes:
            return tq
    # Nothing fits: smallest legal tile.  (The real fix for huge Lk with attn
    # output is a two-pass Lk-tiled variant; output-only callers should use the
    # flash path instead.)
    return cands[-1]


def _select_flash_tiles(Lq, Lk, D, Dv, itemsize, mask_itemsize, budget_bytes):
    """(tq, tk) for the online-softmax path; tk divides Lk (or equals Lk)."""
    tk_cands = [t for t in (2048, 1024, 512, 256, 128) if Lk % t == 0]
    if not tk_cands:
        tk_cands = [Lk]
    for tq in _tq_candidates(Lq):
        for tk in tk_cands:
            in_bytes = (tq * D + tk * (D + Dv)) * itemsize + tq * tk * mask_itemsize
            out_bytes = tq * Dv * itemsize
            scratch = tq * (Dv + 2) * 4
            live = 2 * (in_bytes + out_bytes) + scratch + 3 * tq * tk * 4
            if live <= budget_bytes:
                return tq, tk
    return _tq_candidates(Lq)[-1], tk_cands[-1]


# ---------------------------------------------------------------------------
# Wrapper
# ---------------------------------------------------------------------------
def scaled_dot_product_attention(q, k, v, temperature, mask=None, return_attn=True):
    """Pallas version of ScaledDotProductAttention.forward (eval mode).

    return_attn=True matches the torch module and returns (output, attn).
    return_attn=False runs the flash-style (Lk-tiled, online-softmax) kernel and
    returns output only -- use it when attention weights are not needed.
    """
    B, Lq, D = q.shape
    Bk, Lk, Dk = k.shape
    Bv, Lkv, Dv = v.shape
    assert Dk == D and Bk == B and Bv == B and Lkv == Lk

    inv_temperature = 1.0 / float(temperature)
    itemsize = jnp.dtype(q.dtype).itemsize
    has_mask = mask is not None
    mask_itemsize = 1 if has_mask else 0

    mask_i8 = None
    if has_mask:
        # (mask != 0) avoids the int->int8 wraparound hazard; bool is already 1 byte.
        mask_i8 = mask if mask.dtype == jnp.int8 else (mask != 0).astype(jnp.int8)

    budget_bytes, vmem_limit = _vmem_budget()
    # On a 2-TensorCore part (v7x) shard the batch axis across cores and keep the
    # q-tile axis serial so both cores do not duplicate K/V HBM reads.
    lead_dims = ("parallel", "arbitrary") if B >= 2 else ("parallel", "parallel")
    flops = 2 * B * Lq * Lk * (D + Dv)

    if return_attn:
        tq = _select_tq_full_lk(Lq, Lk, D, Dv, itemsize, mask_itemsize, budget_bytes)
        grid = (B, pl.cdiv(Lq, tq))

        in_specs = [
            pl.BlockSpec((1, tq, D), lambda b, i: (b, i, 0)),     # q tile
            pl.BlockSpec((1, Lk, D), lambda b, i: (b, 0, 0)),     # full K (reused over i)
            pl.BlockSpec((1, Lk, Dv), lambda b, i: (b, 0, 0)),    # full V (reused over i)
        ]
        args = [q, k, v]
        if has_mask:
            in_specs.append(pl.BlockSpec((1, tq, Lk), lambda b, i: (b, i, 0)))
            args.append(mask_i8)

        out_shapes = (jax.ShapeDtypeStruct((B, Lq, Dv), q.dtype),
                      jax.ShapeDtypeStruct((B, Lq, Lk), q.dtype))
        out_specs = (pl.BlockSpec((1, tq, Dv), lambda b, i: (b, i, 0)),
                     pl.BlockSpec((1, tq, Lk), lambda b, i: (b, i, 0)))

        bytes_accessed = ((q.size + k.size + v.size + B * Lq * Dv + B * Lq * Lk)
                          * itemsize + B * Lq * Lk * mask_itemsize)
        kernel = functools.partial(_sdpa_attn_kernel,
                                   inv_temperature=inv_temperature,
                                   has_mask=has_mask)

        out, attn = pl.pallas_call(
            kernel,
            out_shape=out_shapes,
            grid=grid,
            in_specs=in_specs,
            out_specs=out_specs,
            compiler_params=pltpu.CompilerParams(
                dimension_semantics=lead_dims,
                vmem_limit_bytes=vmem_limit),
            cost_estimate=pl.CostEstimate(flops=flops,
                                          transcendentals=B * Lq * Lk,
                                          bytes_accessed=bytes_accessed),
        )(*args)
        return out, attn

    # ------------------ flash (output-only) path ------------------
    tq, tk = _select_flash_tiles(Lq, Lk, D, Dv, itemsize, mask_itemsize, budget_bytes)
    grid = (B, pl.cdiv(Lq, tq), Lk // tk)

    in_specs = [
        pl.BlockSpec((1, tq, D), lambda b, i, j: (b, i, 0)),
        pl.BlockSpec((1, tk, D), lambda b, i, j: (b, j, 0)),
        pl.BlockSpec((1, tk, Dv), lambda b, i, j: (b, j, 0)),
    ]
    args = [q, k, v]
    if has_mask:
        in_specs.append(pl.BlockSpec((1, tq, tk), lambda b, i, j: (b, i, j)))
        args.append(mask_i8)

    bytes_accessed = ((q.size + k.size + v.size + B * Lq * Dv) * itemsize
                      + B * Lq * Lk * mask_itemsize)
    kernel = functools.partial(_sdpa_flash_kernel,
                               inv_temperature=inv_temperature,
                               has_mask=has_mask)

    out = pl.pallas_call(
        kernel,
        out_shape=jax.ShapeDtypeStruct((B, Lq, Dv), q.dtype),
        grid=grid,
        in_specs=in_specs,
        out_specs=pl.BlockSpec((1, tq, Dv), lambda b, i, j: (b, i, 0)),
        scratch_shapes=[pltpu.VMEM((tq, 1), jnp.float32),   # running max
                        pltpu.VMEM((tq, 1), jnp.float32),   # running sum
                        pltpu.VMEM((tq, Dv), jnp.float32)], # f32 accumulator
        compiler_params=pltpu.CompilerParams(
            dimension_semantics=lead_dims + ("arbitrary",),
            vmem_limit_bytes=vmem_limit),
        cost_estimate=pl.CostEstimate(flops=flops,
                                      transcendentals=B * Lq * Lk,
                                      bytes_accessed=bytes_accessed),
    )(*args)
    return out


# ---------------------------------------------------------------------------
# Self-test
# ---------------------------------------------------------------------------
if __name__ == "__main__":
    key = jax.random.PRNGKey(0)
    kq, kk, kv_ = jax.random.split(key, 3)

    B, Lq, Lk, D, Dv = 2, 8, 8, 32, 32
    temperature = float(D) ** 0.5

    q = jax.random.normal(kq, (B, Lq, D), dtype=jnp.float32)
    k = jax.random.normal(kk, (B, Lk, D), dtype=jnp.float32)
    v = jax.random.normal(kv_, (B, Lk, Dv), dtype=jnp.float32)

    def reference(q, k, v, mask=None):
        attn = jnp.einsum("bqd,bkd->bqk", q, k) / temperature
        if mask is not None:
            attn = jnp.where(mask, -jnp.inf, attn)
        attn = jax.nn.softmax(attn, axis=2)
        return jnp.einsum("bqk,bkd->bqd", attn, v), attn

    # --- module-equivalent path (output, attn), unmasked ---
    out, attn = scaled_dot_product_attention(q, k, v, temperature)
    out = jax.block_until_ready(out)
    attn = jax.block_until_ready(attn)
    ref_out, ref_attn = reference(q, k, v)
    assert out.shape == (B, Lq, Dv) and attn.shape == (B, Lq, Lk)
    assert jnp.allclose(out, ref_out, atol=1e-5, rtol=1e-5)
    assert jnp.allclose(attn, ref_attn, atol=1e-5, rtol=1e-5)

    # --- masked (causal; no fully-masked rows) ---
    row = jnp.arange(Lq)[:, None]
    col = jnp.arange(Lk)[None, :]
    mask = jnp.broadcast_to(col > row, (B, Lq, Lk))
    ref_out_m, ref_attn_m = reference(q, k, v, mask)

    out_m, attn_m = scaled_dot_product_attention(q, k, v, temperature, mask=mask)
    out_m = jax.block_until_ready(out_m)
    attn_m = jax.block_until_ready(attn_m)
    assert jnp.allclose(out_m, ref_out_m, atol=1e-5, rtol=1e-5)
    assert jnp.allclose(attn_m, ref_attn_m, atol=1e-5, rtol=1e-5)

    # --- output-only flash path (no attn HBM writeback) ---
    out_f = jax.block_until_ready(
        scaled_dot_product_attention(q, k, v, temperature, return_attn=False))
    assert jnp.allclose(out_f, ref_out, atol=1e-5, rtol=1e-5)

    out_fm = jax.block_until_ready(
        scaled_dot_product_attention(q, k, v, temperature, mask=mask,
                                     return_attn=False))
    assert jnp.allclose(out_fm, ref_out_m, atol=1e-5, rtol=1e-5)

    print("KERNEL_OK")
</pallas_src>

<mosaic_0001>
module attributes {stable_mosaic.version = 11 : i64} {
  func.func @_sdpa_attn_kernel(%arg0: i32, %arg1: i32, %arg2: memref<1x8x32xf32, #tpu.memory_space<vmem>>, %arg3: memref<1x8x32xf32, #tpu.memory_space<vmem>>, %arg4: memref<1x8x32xf32, #tpu.memory_space<vmem>>, %arg5: memref<1x8x32xf32, #tpu.memory_space<vmem>>, %arg6: memref<1x8x8xf32, #tpu.memory_space<vmem>>) attributes {dimension_semantics = [#tpu.dimension_semantics<parallel>, #tpu.dimension_semantics<arbitrary>], iteration_bounds = array<i64: 2, 1>, scalar_prefetch = 0 : i64, scratch_operands = 0 : i64, tpu.core_type = #tpu.core_type<tc>, window_params = [{transform_indices = @transform_0, window_bounds = array<i64: 1, 8, 32>}, {transform_indices = @transform_1, window_bounds = array<i64: 1, 8, 32>}, {transform_indices = @transform_2, window_bounds = array<i64: 1, 8, 32>}, {transform_indices = @transform_3, window_bounds = array<i64: 1, 8, 32>}, {transform_indices = @transform_4, window_bounds = array<i64: 1, 8, 8>}]} {
    %c0 = arith.constant 0 : index
    %c0_0 = arith.constant 0 : index
    %c0_1 = arith.constant 0 : index
    %0 = vector.load %arg2[%c0, %c0_0, %c0_1] : memref<1x8x32xf32, #tpu.memory_space<vmem>>, vector<1x8x32xf32>
    %1 = vector.shape_cast %0 : vector<1x8x32xf32> to vector<8x32xf32>
    %c0_2 = arith.constant 0 : index
    %c0_3 = arith.constant 0 : index
    %c0_4 = arith.constant 0 : index
    %2 = vector.load %arg3[%c0_2, %c0_3, %c0_4] : memref<1x8x32xf32, #tpu.memory_space<vmem>>, vector<1x8x32xf32>
    %3 = vector.shape_cast %2 : vector<1x8x32xf32> to vector<8x32xf32>
    %c0_5 = arith.constant 0 : index
    %c0_6 = arith.constant 0 : index
    %c0_7 = arith.constant 0 : index
    %4 = vector.load %arg4[%c0_5, %c0_6, %c0_7] : memref<1x8x32xf32, #tpu.memory_space<vmem>>, vector<1x8x32xf32>
    %5 = vector.shape_cast %4 : vector<1x8x32xf32> to vector<8x32xf32>
    %cst = arith.constant 0.176776692 : f32
    %6 = vector.broadcast %cst : f32 to vector<8x32xf32>
    %7 = arith.mulf %1, %6 : vector<8x32xf32>
    %cst_8 = arith.constant dense<0.000000e+00> : vector<8x8xf32>
    %8 = tpu.matmul %7, %3, %cst_8 {dimension_numbers = #tpu.dot_dimension_numbers<[1], [1], [0], [0], [0, 0, 1, 0], [], []>} : vector<8x32xf32>, vector<8x32xf32>, vector<8x8xf32> -> vector<8x8xf32>
    %cst_9 = arith.constant dense<0xFF800000> : vector<8xf32>
    %9 = vector.multi_reduction <maximumf>, %8, %cst_9 [1] : vector<8x8xf32> to vector<8xf32>
    %10 = vector.shape_cast %9 : vector<8xf32> to vector<8x1xf32>
    %11 = vector.broadcast %10 : vector<8x1xf32> to vector<8x8xf32>
    %12 = arith.subf %8, %11 : vector<8x8xf32>
    %13 = math.exp %12 : vector<8x8xf32>
    %cst_10 = arith.constant dense<0.000000e+00> : vector<8xf32>
    %14 = vector.multi_reduction <add>, %13, %cst_10 [1] : vector<8x8xf32> to vector<8xf32>
    %15 = vector.shape_cast %14 : vector<8xf32> to vector<8x1xf32>
    %16 = tpu.reciprocal %15 : vector<8x1xf32> -> vector<8x1xf32>
    %17 = vector.broadcast %16 : vector<8x1xf32> to vector<8x8xf32>
    %18 = arith.mulf %13, %17 : vector<8x8xf32>
    %c0_11 = arith.constant 0 : index
    %c0_12 = arith.constant 0 : index
    %c0_13 = arith.constant 0 : index
    %19 = vector.load %arg6[%c0_11, %c0_12, %c0_13] : memref<1x8x8xf32, #tpu.memory_space<vmem>>, vector<1x8x8xf32>
    %20 = vector.shape_cast %19 : vector<1x8x8xf32> to vector<8x8xf32>
    %21 = vector.shape_cast %18 : vector<8x8xf32> to vector<1x8x8xf32>
    tpu.vector_store %arg6[%c0_11, %c0_12, %c0_13], %21 {strides = array<i32>} : memref<1x8x8xf32, #tpu.memory_space<vmem>>, vector<1x8x8xf32>,
    %cst_14 = arith.constant dense<0.000000e+00> : vector<8x32xf32>
    %22 = tpu.matmul %18, %5, %cst_14 {dimension_numbers = #tpu.dot_dimension_numbers<[1], [0], [0], [1], [0, 0, 1, 1], [], []>} : vector<8x8xf32>, vector<8x32xf32>, vector<8x32xf32> -> vector<8x32xf32>
    %c0_15 = arith.constant 0 : index
    %c0_16 = arith.constant 0 : index
    %c0_17 = arith.constant 0 : index
    %23 = vector.load %arg5[%c0_15, %c0_16, %c0_17] : memref<1x8x32xf32, #tpu.memory_space<vmem>>, vector<1x8x32xf32>
    %24 = vector.shape_cast %23 : vector<1x8x32xf32> to vector<8x32xf32>
    %25 = vector.shape_cast %22 : vector<8x32xf32> to vector<1x8x32xf32>
    tpu.vector_store %arg5[%c0_15, %c0_16, %c0_17], %25 {strides = array<i32>} : memref<1x8x32xf32, #tpu.memory_space<vmem>>, vector<1x8x32xf32>,
    return
  }
  func.func @transform_0(%arg0: i32, %arg1: i32) -> (i32, i32, i32) {
    %c0_i32 = arith.constant 0 : i32
    %c0_i32_0 = arith.constant 0 : i32
    return %arg0, %arg1, %c0_i32 : i32, i32, i32
  }
  func.func @transform_1(%arg0: i32, %arg1: i32) -> (i32, i32, i32) {
    %c0_i32 = arith.constant 0 : i32
    %c0_i32_0 = arith.constant 0 : i32
    %c0_i32_1 = arith.constant 0 : i32
    return %arg0, %c0_i32, %c0_i32_0 : i32, i32, i32
  }
  func.func @transform_2(%arg0: i32, %arg1: i32) -> (i32, i32, i32) {
    %c0_i32 = arith.constant 0 : i32
    %c0_i32_0 = arith.constant 0 : i32
    %c0_i32_1 = arith.constant 0 : i32
    return %arg0, %c0_i32, %c0_i32_0 : i32, i32, i32
  }
  func.func @transform_3(%arg0: i32, %arg1: i32) -> (i32, i32, i32) {
    %c0_i32 = arith.constant 0 : i32
    %c0_i32_0 = arith.constant 0 : i32
    return %arg0, %arg1, %c0_i32 : i32, i32, i32
  }
  func.func @transform_4(%arg0: i32, %arg1: i32) -> (i32, i32, i32) {
    %c0_i32 = arith.constant 0 : i32
    %c0_i32_0 = arith.constant 0 : i32
    return %arg0, %arg1, %c0_i32 : i32, i32, i32
  }
}

</mosaic_0001>

<bundles_post_ra>
// kernel: tpu_custom_call.1
= control target key start
LH: loop header
LB: loop body
LE: loop exit
PB: predicated region body
PF: predicated region fallthrough
CT: control target
= control target key end

     0   :  { %s1335_s0 = inlined_call_operand.hbm [shape: f32[2,8,32], index: 0, kind: input, shape index: {}]   ;;  %s1336_s1 = inlined_call_operand.hbm [shape: f32[2,8,32], index: 1, kind: input, shape index: {}]   ;;  %s1337_s2 = inlined_call_operand.hbm [shape: f32[2,8,32], index: 2, kind: input, shape index: {}]   ;;  %s1338_s3 = inlined_call_operand.hbm [shape: f32[2,8,32], index: 3, kind: output, shape index: {0}]   ;;  %s1339_s4 = inlined_call_operand.hbm [shape: f32[2,8,8], index: 4, kind: output, shape index: {1}]  }
   0x1   :  { %1348 = sst [smem:[#allocation19_spill]] %s1336_s1 }
   0x2   :  { %10 = vsyncpa [#allocation3], 0 }
   0x3   :  { %12 = vsyncpa [#allocation3 + $0x1], 0 }
   0x4   :  { %13 = vsyncpa [#allocation6], 0 }
   0x5   :  { %15 = vsyncpa [#allocation6 + $0x1], 0 }
   0x6   :  { %16 = vsyncpa [#allocation4], 0 }
   0x7   :  { %18 = vsyncpa [#allocation4 + $0x1], 0 }
   0x8   :  { %19 = vsyncpa [#allocation10], 0 }
   0x9   :  { %21 = vsyncpa [#allocation10 + $0x1], 0  ;;  %s1036_s15 = smov 0   ;;  %s1038_s16 = smov 0  }
   0xa   :  { %s1040_s17 = smov 0   ;;  %s1042_s18 = smov 0  }
   0xb   :  { %s1044_s19 = smov 0   ;;  %s1046_s20 = smov 0  }
   0xc LB: > { %1349 = sst [smem:[#allocation15_spill]] %s998_s19  ;;  %s1067_s21 = sadd.s32 4294967295, %s1002_s20   ;;  %s1002_s20 = sphi %s1046_s20, %s27_s20   ;;  %s998_s19 = sphi %s1044_s19, %s1373_s19   ;;  %s994_s18 = sphi %s1042_s18, %s1372_s18   ;;  %s990_s17 = sphi %s1040_s17, %s1376_s17   ;;  %s986_s16 = sphi %s1038_s16, %s1375_s16   ;;  %s982_s15 = sphi %s1036_s15, %s1374_s15  }
   0xd   : > { %1350 = sst [smem:[#allocation16_spill]] %s1002_s20  ;;  %s673_s22 = sadd.s32 4294967294, %s1002_s20  }
   0xe   : > { %s39_s23 = sadd.s32 1, %s998_s19  ;;  %s48_s24 = sadd.s32 1, %s990_s17 }
   0xf   : > { %p41_p0 = scmp.ge.s32.totalorder %s39_s23, 2  ;;  %p55_p1 = scmp.ne.s32.totalorder %s990_s17, %s986_s16 }
  0x10   : > { %p56_p2 = scmp.eq.s32.totalorder %s1002_s20, 0  ;;  %p61_p3 = scmp.ne.s32.totalorder %s986_s16, %s982_s15 }
  0x11   : > { %s1378_s23 = smov (%p41_p0, %s39_s23), 0  ;;  %p62_p5 = scmp.eq.s32.totalorder %s1067_s21, 0 }
  0x12   : > { %1351 = sst [smem:[#allocation17_spill]] %s1378_s23  ;;  %p1079_p4 = por %p56_p2, %p55_p1 }
  0x13   : > { %s43_s26 = ssub.s32 %s998_s19, %s1378_s23  ;;  %p139_p6 = scmp.eq.s32.totalorder %s1067_s21, 1 }
  0x14   : > { %p46_p7 = scmp.eq.s32.totalorder %s43_s26, 0  ;;  %p1087_p8 = por %p62_p5, %p61_p3 }
  0x15   : > { %p1091_p9 = por %p139_p6, %p55_p1  ;;  %p145_p10 = scmp.eq.s32.totalorder %s673_s22, 1 }
  0x16   : > { %s1353_s27 = scalar_select %p1087_p8, 1, 0 }
  0x17   : > { %s1354_s28 = scalar_select %p1091_p9, 1, 0 }
  0x18   : > { %s1096_s29 = scalar_select %p46_p7, %s990_s17, %s48_s24  }
  0x19   : > { %p1098_p11 = por %p145_p10, %p61_p3  ;;  %p738_p13 = scmp.lt.s32.totalorder %s1002_s20, 2 }
  0x1a   : > { %1355 = sst [smem:[#allocation18_spill]] %s1096_s29  ;;  %s1340_s5 = sand.u32 1, %s990_s17  }
  0x1b   : > { %s1356_s30 = scalar_select %p1098_p11, 1, 0 }
  0x1c   : > { %s1107_s6 = sshll.u32 %s1340_s5, 3  ;;  %s1110_s7 = sshll.u32 %s998_s19, 7 }
  0x1d   : > { %p1114_p0 = pnand %p738_p13, %p1079_p4  ;;  %s212_s9 = sand.u32 1, %s1002_s20  }
  0x1e   : > { %s1358_s1 = sld [smem:[#allocation19_spill]]  ;;  %s216_s13 = scalar_lea.vmem [#allocation5], %s1107_s6 }
  0x1f   : > { %s1357_s8 = scalar_select %p1114_p0, 1, 0 }
  0x20   : > { %s223_s14 = sshll.u32 %s216_s13, 4  ;;  %s1130_s22 = scalar_lea.sflag [#allocation6], %s212_s9  ;;  %s1127_s14 = int_to_ptr.vmem [resolvable:$true] %s223_s14 }
  0x21   : > { %p1136_p4 = pneg %p1114_p0 }
  0x24   : > { %s1123_s12 = scalar_lea.hbm %s1358_s1, %s1110_s7  ;;  %s799_s11 = scalar_lea.hbm %s1358_s1, 256 }
  0x25   : > { %s794_s24 = scalar_lea.hbm %s1123_s12, 128  ;;  %p800_p7 = scmp.lt.u32.totalorder %s1123_s12, %s1358_s1 }
  0x26   : > { %p795_p3 = scmp.ne.s32.totalorder %s1123_s12, %s794_s24  ;;  %p801_p10 = scmp.lt.u32.totalorder %s799_s11, %s794_s24 }
  0x27   : > { %p803_p12 = scmp.lt.u32.totalorder %s794_s24, %s1123_s12 }
  0x28   : > { %p797_p5 = pnand %p1136_p4, %p795_p3  ;;  %p802_p13 = por %p801_p10, %p800_p7 }
  0x2a   : > { %p798_p6 = pneg %p797_p5  ;;  %p804_p1 = por %p803_p12, %p802_p13 }
  0x2c   : > { %p805_p2 = pnand %p804_p1, %p798_p6 }
  0x2e   : > { %808 = shalt.err (!%p805_p2)
}
  0x2f   : > { %s809_s9 = scalar_lea.vmem %s1127_s14, 128  ;;  %s1004_s26 = smov [#allocation5]  }
  0x30   : > { %p810_p3 = scmp.ne.s32.totalorder %s1127_s14, %s809_s9  ;;  %s814_s10 = sshll.u32 %s1004_s26, 4  ;;  %s815_s10 = int_to_ptr.vmem [resolvable:$false] %s814_s10 }
  0x31   : > { %s816_s5 = scalar_lea.vmem %s815_s10, 256  ;;  %p817_p9 = scmp.lt.s32.totalorder %s1127_s14, %s815_s10 }
  0x32   : > { %p812_p5 = pnand %p810_p3, %p1136_p4  ;;  %p818_p8 = scmp.lt.s32.totalorder %s816_s5, %s809_s9 }
  0x34   : > { %p813_p11 = pneg %p812_p5  ;;  %p819_p7 = por %p818_p8, %p817_p9 }
  0x36   : > { %p820_p10 = pnand %p819_p7, %p813_p11 }
  0x38   : > { %823 = shalt.err (!%p820_p10)
}
  0x39   : > { %727 = dma.hbm_to_vmem [thread:$0]  (!%p1114_p0), %s1123_s12, 128, %s1127_s14, %s1130_s22  }
  0x3a   : > { %p1360_p12 = scmp.lt.s32.totalorder %s1002_s20, 3  ;;  %p1361_p1 = scmp.ge.s32.totalorder %s1002_s20, 1 }
  0x3b   : > { %s1172_s9 = scalar_lea.hbm %s1335_s0, %s1110_s7  ;;  %s197_s26 = scalar_lea.vmem [#allocation2], %s1107_s6 }
  0x3c   : > { %p1164_p2 = pnand %p1361_p1, %p1360_p12  ;;  %s205_s10 = sshll.u32 %s197_s26, 4  ;;  %s1175_s10 = int_to_ptr.vmem [resolvable:$true] %s205_s10 }
  0x3d   : > { %s1181_s5 = scalar_lea.hbm %s1337_s2, %s1110_s7  ;;  %s1363_s1 = sand.u32 1, %s990_s17  }
  0x3e   : > { %s1362_s24 = scalar_select %p1164_p2, 1, 0 }
  0x3f   : > { %s194_s23 = scalar_lea.sflag [#allocation3], %s1363_s1  ;;  %s824_s19 = scalar_lea.hbm %s1172_s9, 128 }
  0x40   : > { %p825_p8 = scmp.ne.s32.totalorder %s1172_s9, %s824_s19  ;;  %s829_s29 = scalar_lea.hbm %s1335_s0, 256 }
  0x41   : > { %p830_p6 = scmp.lt.u32.totalorder %s1172_s9, %s1335_s0  ;;  %p831_p13 = scmp.lt.u32.totalorder %s829_s29, %s824_s19 }
  0x42   : > { %p827_p9 = pnand %p825_p8, %p1136_p4  ;;  %p833_p5 = scmp.lt.u32.totalorder %s824_s19, %s1172_s9 }
  0x43   : > { %p832_p3 = por %p831_p13, %p830_p6 }
  0x44   : > { %p828_p11 = pneg %p827_p9 }
  0x45   : > { %p834_p7 = por %p833_p5, %p832_p3 }
  0x47   : > { %p835_p10 = pnand %p834_p7, %p828_p11 }
  0x49   : > { %838 = shalt.err (!%p835_p10)
}
  0x4a   : > { %s839_s1 = scalar_lea.vmem %s1175_s10, 128  ;;  %s1005_s7 = smov [#allocation2]  }
  0x4b   : > { %p840_p12 = scmp.ne.s32.totalorder %s1175_s10, %s839_s1  ;;  %s844_s12 = sshll.u32 %s1005_s7, 4  ;;  %s845_s12 = int_to_ptr.vmem [resolvable:$false] %s844_s12 }
  0x4c   : > { %s846_s20 = scalar_lea.vmem %s845_s12, 256  ;;  %p847_p9 = scmp.lt.s32.totalorder %s1175_s10, %s845_s12 }
  0x4d   : > { %p842_p1 = pnand %p840_p12, %p1136_p4  ;;  %p848_p2 = scmp.lt.s32.totalorder %s846_s20, %s839_s1 }
  0x4f   : > { %p843_p8 = pneg %p842_p1  ;;  %p849_p6 = por %p848_p2, %p847_p9 }
  0x51   : > { %p850_p13 = pnand %p849_p6, %p843_p8 }
  0x53   : > { %853 = shalt.err (!%p850_p13)
}
  0x54   : > { %724 = dma.hbm_to_vmem [thread:$0]  (!%p1114_p0), %s1172_s9, 128, %s1175_s10, %s194_s23  }
  0x55   : > { %s234_s19 = scalar_lea.vmem [#allocation7], %s1107_s6  ;;  %s854_s14 = scalar_lea.hbm %s1181_s5, 128 }
  0x56   : > { %s241_s29 = sshll.u32 %s234_s19, 4  ;;  %p855_p11 = scmp.ne.s32.totalorder %s1181_s5, %s854_s14  ;;  %s242_s29 = int_to_ptr.vmem [resolvable:$true] %s241_s29 }
  0x57   : > { %s859_s26 = scalar_lea.hbm %s1337_s2, 256  ;;  %p860_p5 = scmp.lt.u32.totalorder %s1181_s5, %s1337_s2 }
  0x58   : > { %p857_p2 = pnand %p855_p11, %p1136_p4  ;;  %p861_p7 = scmp.lt.u32.totalorder %s859_s26, %s854_s14 }
  0x59   : > { %p863_p12 = scmp.lt.u32.totalorder %s854_s14, %s1181_s5 }
  0x5a   : > { %p858_p3 = pneg %p857_p2  ;;  %p862_p10 = por %p861_p7, %p860_p5 }
  0x5c   : > { %p864_p1 = por %p863_p12, %p862_p10 }
  0x5e   : > { %p865_p8 = pnand %p864_p1, %p858_p3 }
  0x60   : > { %868 = shalt.err (!%p865_p8)
}
  0x61   : > { %s869_s23 = scalar_lea.vmem %s242_s29, 128  ;;  %s1006_s6 = smov [#allocation7]  }
  0x62   : > { %p870_p9 = scmp.ne.s32.totalorder %s242_s29, %s869_s23  ;;  %s874_s9 = sshll.u32 %s1006_s6, 4  ;;  %s875_s9 = int_to_ptr.vmem [resolvable:$false] %s874_s9 }
  0x63   : > { %s876_s10 = scalar_lea.vmem %s875_s9, 256  ;;  %p877_p11 = scmp.lt.s32.totalorder %s242_s29, %s875_s9 }
  0x64   : > { %p872_p6 = pnand %p870_p9, %p1136_p4  ;;  %p878_p2 = scmp.lt.s32.totalorder %s876_s10, %s869_s23 }
  0x66   : > { %p873_p13 = pneg %p872_p6  ;;  %p879_p0 = por %p878_p2, %p877_p11 }
  0x68   : > { %p880_p5 = pnand %p879_p0, %p873_p13 }
  0x6a   : > { %883 = shalt.err (!%p880_p5)
}
  0x6b   : > { %p1364_p7 = scmp.ne.s32.totalorder %s1357_s8, 0  ;;  %p1365_p3 = scmp.ne.s32.totalorder %s1362_s24, 0 }
  0x6c   : > { %s1228_s25 = sand.u32 (!%p1365_p3), 1, %s986_s16   ;;  %p1366_p0 = scmp.ne.s32.totalorder (!%p1365_p3), %s1353_s27, 0 }
  0x6d   : > { %730 = dma.hbm_to_vmem [thread:$0]  (!%p1364_p7), %s1181_s5, 128, %s242_s29, %s1130_s22  }
  0x6e   : > { %250 = sbr.rel (%p1365_p3) target bundleno = 879 (0x36f), region = 32  ;;  %s1231_s12 = sshll.u32 (!%p1365_p3), %s1228_s25, 3 }
  0x6f   : > { %s253_s20 = scalar_lea.sflag (!%p1365_p3), [#allocation3], %s1228_s25  ;;  %s256_s19 = scalar_lea.vmem (!%p1365_p3), [#allocation2], %s1231_s12 }
  0x75   : > { %965 = dma.done.wait (%p1366_p0), %s253_s20, 128  }
  0x76   : > { %967 = vsyncadd (%p1366_p0), %s253_s20, 4294967168  ;;  %s261_s8 = sand.u32 1, %s1067_s21   ;;  %s265_s24 = scalar_lea.vmem [#allocation5], %s1231_s12 }
  0x77   : > { %s262_s22 = scalar_lea.sflag [#allocation6], %s261_s8 }
  0x78   : > { %969 = dma.done.wait (%p1366_p0), %s262_s22, 256  }
  0x79   : > { %971 = vsyncadd (%p1366_p0), %s262_s22, 4294967040  ;;  %v1007_v0 = vmov 0.0   ;;  %vm1008_vm0 = vmmov 0   ;;  %vm318_vm1 = vcmask 261120   ;;  %v315_v1 = vld [vmem:[%s265_s24] sm:$0xff]  ;;  %v314_v2 = vld [vmem:[%s256_s19] sm:$0xff] }
  0x7a   : > { %701 = vmatprep.subr.mxu0 %v1007_v0  ;;  %703 = vmatprep.mubr.msk.f32.mxu0 %vm1008_vm0, %v1007_v0  ;;  %v317_v3 = vmul.f32 0.17677669, %v314_v2  ;;  %vm395_vm2 = vcmask 64512   ;;  %s274_s21 = scalar_lea.vmem [#allocation7], %s1231_s12  ;;  %s313_s27 = scalar_lea.vmem [#allocation9], %s1231_s12 }
  0x7b   : > { %706 = vmatprep.subr.mxu1 %v1007_v0  ;;  %708 = vmatprep.mubr.msk.f32.mxu1 %vm1008_vm0, %v1007_v0  ;;  %v316_v12 = vld [vmem:[%s274_s21] sm:$0xff]  ;;  %s693_s5 = sshll.u32 %s994_s18, 7  ;;  %s516_s13 = sshll.u32 %s313_s27, 4  ;;  %s517_s13 = int_to_ptr.vmem [resolvable:$true] %s516_s13 }
  0x7c   : > { %702 = vmatpush3.xpose.msk.msra.mxu0 %vm318_vm1, %v315_v1  ;;  %707 = vmatpush3.msra.mxu1 %v316_v12  ;;  %s1259_s11 = scalar_lea.hbm %s1339_s4, %s693_s5  ;;  %s488_s26 = scalar_lea.sflag [#allocation10], %s1228_s25 }
  0x7d   : > { %s884_s1 = scalar_lea.vmem %s517_s13, 128  ;;  %p1367_p10 = scmp.ne.s32.totalorder %s1354_s28, 0 }
  0x7e   : > { %p885_p4 = scmp.ne.s32.totalorder %s517_s13, %s884_s1  ;;  %s1009_s7 = smov [#allocation9]  }
  0x7f   : > { %704 = vmatmul.mubr.msk.f32.vlgmr.msra.gmra.mrb[0].mxu0 %vm318_vm1, %v317_v3  ;;  %s888_s23 = sshll.u32 %s1009_s7, 4  ;;  %s889_s23 = int_to_ptr.vmem [resolvable:$false] %s888_s23 }
  0x80   : > { %p886_p12 = pnand %p885_p4, %p1367_p10  ;;  %s890_s6 = scalar_lea.vmem %s889_s23, 256 }
  0x81   : > { %p891_p8 = scmp.lt.s32.totalorder %s517_s13, %s889_s23  ;;  %p892_p9 = scmp.lt.s32.totalorder %s890_s6, %s884_s1 }
  0x82   : > { %p887_p1 = pneg %p886_p12 }
  0x83   : > { %p893_p6 = por %p892_p9, %p891_p8 }
  0x85   : > { %p894_p13 = pnand %p893_p6, %p887_p1 }
 0x152   : > { %v391_v4 = vpop.f32.mrb[0].mxu0 }
 0x153   : > { %v705_v5 = vpop.f32.mrb[1].mxu0  ;;  %v396_v6 = vsel %vm395_vm2, %v391_v4, -inf }
 0x154   : > { %397 = vmax.xlane.f32.xlu0 %v396_v6 }
 0x1e1   : > { %v398_v7 = vpop.xlane.xlu0 %397 }
 0x1e2   : > { %v399_v8 = vsub.f32 %v391_v4, %v398_v7 }
 0x1e4   : > { %v400_v9 = vmul.f32 1.442695, %v399_v8 }
 0x1e6   : > { %790 = vpow2.f32 %v400_v9 }
 0x1f0   : > { %v791_v10 = vpop.eup %790 }
 0x1f1   : > { %v402_v11 = vsel %vm395_vm2, %v791_v10, 0.0 }
 0x1f2   : > { %403 = vadd.xlane.f32.xlu0 %v402_v11 }
 0x27f   : > { %v404_v13 = vpop.xlane.xlu0 %403 }
 0x280   : > { %792 = vrcp.f32 %v404_v13 }
 0x28a   : > { %v793_v14 = vpop.eup %792 }
 0x28b   : > { %v406_v15 = vmul.f32 %v793_v14, %v791_v10 }
 0x28d   : > { %709 = vmatmul.mubr.msk.f32.vlgmr.msra.gmra.mrb[0].mxu1 %vm395_vm2, %v406_v15  ;;  %407 = vst.msk [vmem:[%s313_s27] sm:$0xff] %vm395_vm2, %v406_v15 }
 0x28e   : > { %897 = shalt.err (!%p894_p13)
}
 0x28f   : > { %s898_s9 = scalar_lea.hbm %s1259_s11, 128  ;;  %s902_s19 = scalar_lea.hbm %s1339_s4, 256 }
 0x290   : > { %p899_p11 = scmp.ne.s32.totalorder %s1259_s11, %s898_s9  ;;  %p903_p7 = scmp.lt.u32.totalorder %s1259_s11, %s1339_s4 }
 0x291   : > { %p904_p3 = scmp.lt.u32.totalorder %s902_s19, %s898_s9  ;;  %p906_p4 = scmp.lt.u32.totalorder %s898_s9, %s1259_s11 }
 0x292   : > { %p900_p2 = pnand %p899_p11, %p1367_p10 }
 0x293   : > { %p905_p0 = por %p904_p3, %p903_p7 }
 0x294   : > { %p901_p5 = pneg %p900_p2 }
 0x295   : > { %p907_p12 = por %p906_p4, %p905_p0 }
 0x297   : > { %p908_p1 = pnand %p907_p12, %p901_p5 }
 0x299   : > { %911 = shalt.err (!%p908_p1)
}
 0x29a   : > { %718 = dma.vmem_to_hbm [thread:$0]  (%p1367_p10), %s517_s13, 128, %s1259_s11, %s488_s26  }
 0x29b   : > { %s306_s24 = scalar_lea.vmem [#allocation8], %s1231_s12  ;;  %s1285_s14 = scalar_lea.hbm %s1338_s3, %s693_s5 }
 0x29c   : > { %s502_s21 = sshll.u32 %s306_s24, 4  ;;  %s483_s1 = scalar_lea.sflag [#allocation4], %s1228_s25  ;;  %s1287_s21 = int_to_ptr.vmem [resolvable:$true] %s502_s21 }
 0x29d   : > { %s912_s7 = scalar_lea.vmem %s1287_s21, 128  ;;  %s1010_s18 = smov [#allocation8]  }
 0x29e   : > { %p913_p8 = scmp.ne.s32.totalorder %s1287_s21, %s912_s7  ;;  %s916_s12 = sshll.u32 %s1010_s18, 4  ;;  %s917_s12 = int_to_ptr.vmem [resolvable:$false] %s916_s12 }
 0x29f   : > { %s918_s5 = scalar_lea.vmem %s917_s12, 256  ;;  %p919_p13 = scmp.lt.s32.totalorder %s1287_s21, %s917_s12 }
 0x2a0   : > { %p914_p9 = pnand %p913_p8, %p1367_p10  ;;  %p920_p11 = scmp.lt.s32.totalorder %s918_s5, %s912_s7 }
 0x2a2   : > { %p915_p6 = pneg %p914_p9  ;;  %p921_p2 = por %p920_p11, %p919_p13 }
 0x2a4   : > { %p922_p5 = pnand %p921_p2, %p915_p6 }
 0x360   : > { %v477_v16 = vpop.f32.mrb[0].mxu1 }
 0x361   : > { %481 = vst.msk [vmem:[%s306_s24] sm:$0xff] %vm318_vm1, %v477_v16  ;;  %v710_v17 = vpop.f32.mrb[1].mxu1 }
 0x362   : > { %925 = shalt.err (!%p922_p5)
}
 0x363   : > { %s926_s25 = scalar_lea.hbm %s1285_s14, 128  ;;  %s930_s26 = scalar_lea.hbm %s1338_s3, 256 }
 0x364   : > { %p927_p7 = scmp.ne.s32.totalorder %s1285_s14, %s926_s25  ;;  %p931_p4 = scmp.lt.u32.totalorder %s1285_s14, %s1338_s3 }
 0x365   : > { %p932_p12 = scmp.lt.u32.totalorder %s930_s26, %s926_s25  ;;  %p934_p8 = scmp.lt.u32.totalorder %s926_s25, %s1285_s14 }
 0x366   : > { %p928_p3 = pnand %p927_p7, %p1367_p10 }
 0x367   : > { %p933_p1 = por %p932_p12, %p931_p4 }
 0x368   : > { %p929_p0 = pneg %p928_p3 }
 0x369   : > { %p935_p9 = por %p934_p8, %p933_p1 }
 0x36b   : > { %p936_p6 = pnand %p935_p9, %p929_p0 }
 0x36d   : > { %939 = shalt.err (!%p936_p6)
}
 0x36e   : > { %717 = dma.vmem_to_hbm [thread:$0]  (%p1367_p10), %s1287_s21, 128, %s1285_s14, %s483_s1  }
 0x36f PF: > { %s1368_s9 = sld [smem:[#allocation16_spill]]  ;;  %s528_s10 = sand.u32 1, %s982_s15  }
 0x370   : > { %p1369_p13 = scmp.ne.s32.totalorder %s1356_s30, 0  ;;  %s529_s20 = scalar_lea.sflag [#allocation4], %s528_s10 }
 0x375   : > { %p1370_p11 = scmp.ge.s32.totalorder %s1368_s9, 2 }
 0x377   : > { %p732_p2 = pnand %p1370_p11, %p1369_p13 }
 0x379   : > { %973 = dma.done.wait (!%p732_p2), %s529_s20, 128  }
 0x37a   : > { %975 = vsyncadd (!%p732_p2), %s529_s20, 4294967168  ;;  %s538_s19 = scalar_lea.sflag [#allocation10], %s528_s10 }
 0x37b   : > { %977 = dma.done.wait (!%p732_p2), %s538_s19, 128  }
 0x37c   : > { %979 = vsyncadd (!%p732_p2), %s538_s19, 4294967168  ;;  %s27_s20 = sadd.s32 1, %s1368_s9   ;;  %s1371_s28 = sld [smem:[#allocation18_spill]] }
 0x37d   : > { %p24_p5 = scmp.ge.s32.totalorder %s27_s20, 4   ;;  %s1372_s18 = sld [smem:[#allocation15_spill]] }
 0x37e   : > { %s1373_s19 = sld [smem:[#allocation17_spill]]  ;;  %s1374_s15 = smov %s986_s16 }
 0x37f   : > { %s1375_s16 = smov %s990_s17  ;;  %26 = sbr.rel (!%p24_p5) target bundleno = 12 (0xc), region = 118 }
 0x382   : > { %s1376_s17 = smov %s1371_s28 }
 0x386   :  { %543 = vsyncpa [#allocation3], 1 }
 0x387   :  { %545 = vsyncpa [#allocation3 + $0x1], 1 }
 0x388   :  { %546 = vsyncpa [#allocation6], 1 }
 0x389   :  { %548 = vsyncpa [#allocation6 + $0x1], 1 }
 0x38a   :  { %549 = vsyncpa [#allocation4], 1 }
 0x38b   :  { %551 = vsyncpa [#allocation4 + $0x1], 1 }
 0x38c   :  { %552 = vsyncpa [#allocation10], 1 }
 0x38d   :  { %554 = vsyncpa [#allocation10 + $0x1], 1 }

</bundles_post_ra>
